<compile_context>
chip_gen: v7x
topology: tpu7x:2x2x1
jax: 0.10.0
libtpu: 0.0.40
codegen_flags: <defaults>
</compile_context>

<pallas_src>
import functools

import jax
import jax.numpy as jnp
from jax.experimental import pallas as pl
from jax.experimental.pallas import tpu as pltpu


# --------------------------------------------------------------------------
# Fused gradient-magnitude + L1 reduction kernel
# --------------------------------------------------------------------------
def _grad_l1_kernel(x_ref, y_ref, o_ref, acc_ref, *, eps, inv_count):
    step = pl.program_id(0)

    @pl.when(step == 0)
    def _():
        acc_ref[0] = 0.0

    def grad_mag(t):
        # t: (tb, H, W) f32 tile. Zero-padded central-difference stencil.
        tb, H, W = t.shape
        zrow = jnp.zeros((tb, 1, W), t.dtype)
        zcol = jnp.zeros((tb, H, 1), t.dtype)
        up = jnp.concatenate([t[:, 1:, :], zrow], axis=1)     # x[i+1, j]
        down = jnp.concatenate([zrow, t[:, :-1, :]], axis=1)  # x[i-1, j]
        right = jnp.concatenate([t[:, :, 1:], zcol], axis=2)  # x[i, j+1]
        left = jnp.concatenate([zcol, t[:, :, :-1]], axis=2)  # x[i, j-1]
        gv = up - down
        gh = right - left
        return jnp.sqrt(gv * gv + gh * gh + eps)               # EUP sqrt

    gx = grad_mag(x_ref[...])
    gy = grad_mag(y_ref[...])
    part = jnp.sum(jnp.abs(gx - gy))                            # f32 reduce
    acc_ref[0] = acc_ref[0] + part

    @pl.when(step == pl.num_programs(0) - 1)
    def _():
        o_ref[0, 0] = acc_ref[0] * inv_count


def _pick_row_tile(B, H, W, *, bytes_per_elem=4, budget_bytes=2 * 1024 * 1024):
    """Rows per grid step: 2 inputs x double-buffered tiles within budget."""
    per_row = H * W * bytes_per_elem * 2 * 2
    tb = max(1, min(B, budget_bytes // max(per_row, 1)))
    while B % tb:
        tb -= 1
    return tb


def gradient_loss(x, y, *, channels=3, loss_type="l1", eps=1e-6):
    """Pallas equivalent of GradientLoss()(input, target) -> scalar."""
    if loss_type != "l1":
        raise NotImplementedError(f"loss type [{loss_type}] is not found")
    assert x.shape == y.shape, "Two tensor must have the same shape."
    N, C, H, W = x.shape
    assert C == channels, (C, channels)

    B = N * C
    x2 = x.reshape(B, H, W).astype(jnp.float32)
    y2 = y.reshape(B, H, W).astype(jnp.float32)
    tb = _pick_row_tile(B, H, W)
    inv_count = 1.0 / float(N * C * H * W)

    out = pl.pallas_call(
        functools.partial(_grad_l1_kernel, eps=float(eps), inv_count=inv_count),
        out_shape=jax.ShapeDtypeStruct((1, 1), jnp.float32),
        grid_spec=pltpu.PrefetchScalarGridSpec(
            num_scalar_prefetch=0,
            grid=(B // tb,),
            in_specs=[
                pl.BlockSpec((tb, H, W), lambda i: (i, 0, 0)),
                pl.BlockSpec((tb, H, W), lambda i: (i, 0, 0)),
            ],
            out_specs=pl.BlockSpec(memory_space=pltpu.MemorySpace.SMEM),
            scratch_shapes=[pltpu.SMEM((1,), jnp.float32)],
        ),
        compiler_params=pltpu.CompilerParams(
            dimension_semantics=("arbitrary",)),  # sequential scalar accumulation
    )(x2, y2)
    return out[0, 0]


# --------------------------------------------------------------------------
# Pure-JAX reference (for correctness check only)
# --------------------------------------------------------------------------
def _ref_gradient_loss(x, y, eps=1e-6):
    def grad(t):
        tp = jnp.pad(t, ((0, 0), (0, 0), (1, 1), (1, 1)))
        gv = tp[:, :, 2:, 1:-1] - tp[:, :, :-2, 1:-1]
        gh = tp[:, :, 1:-1, 2:] - tp[:, :, 1:-1, :-2]
        return jnp.sqrt(gv * gv + gh * gh + eps)

    return jnp.mean(jnp.abs(grad(x) - grad(y)))


if __name__ == "__main__":
    key = jax.random.PRNGKey(0)
    kx, ky, kx2, ky2 = jax.random.split(key, 4)

    # Small shape consistent with the module defaults (channels=3), NCHW.
    x = jax.random.uniform(kx, (2, 3, 16, 16), jnp.float32)
    y = jax.random.uniform(ky, (2, 3, 16, 16), jnp.float32)

    fwd = jax.jit(functools.partial(gradient_loss, channels=3, eps=1e-6))
    loss = jax.block_until_ready(fwd(x, y))
    assert loss.shape == (), loss.shape
    assert bool(jnp.isfinite(loss))
    ref = _ref_gradient_loss(x, y, eps=1e-6)
    assert bool(jnp.allclose(loss, ref, rtol=1e-5, atol=1e-6)), (loss, ref)

    # Larger shape to exercise multi-step grid accumulation / pipelining.
    xb = jax.random.uniform(kx2, (4, 3, 128, 256), jnp.float32)
    yb = jax.random.uniform(ky2, (4, 3, 128, 256), jnp.float32)
    loss_b = jax.block_until_ready(fwd(xb, yb))
    ref_b = _ref_gradient_loss(xb, yb, eps=1e-6)
    assert bool(jnp.allclose(loss_b, ref_b, rtol=1e-5, atol=1e-6)), (loss_b, ref_b)

    print("KERNEL_OK")
</pallas_src>

<mosaic_0001>
module attributes {stable_mosaic.version = 11 : i64} {
  func.func @_grad_l1_kernel(%arg0: i32, %arg1: memref<6x16x16xf32, #tpu.memory_space<vmem>>, %arg2: memref<6x16x16xf32, #tpu.memory_space<vmem>>, %arg3: memref<1x1xf32, #tpu.memory_space<smem>>, %arg4: memref<1xf32, #tpu.memory_space<smem>>) attributes {dimension_semantics = [#tpu.dimension_semantics<arbitrary>], iteration_bounds = array<i64: 1>, scalar_prefetch = 0 : i64, scratch_operands = 1 : i64, tpu.core_type = #tpu.core_type<tc>, window_params = [{transform_indices = @transform_0, window_bounds = array<i64: 6, 16, 16>}, {transform_indices = @transform_1, window_bounds = array<i64: 6, 16, 16>}, {transform_indices = @transform_2, window_bounds = array<i64: 1, 1>}]} {
    %c0_i32 = arith.constant 0 : i32
    %0 = arith.cmpi eq, %arg0, %c0_i32 : i32
    %1 = arith.extui %0 : i1 to i32
    %c0_i32_0 = arith.constant 0 : i32
    %2 = arith.cmpi ne, %1, %c0_i32_0 : i32
    scf.if %2 {
      %cst_16 = arith.constant 0.000000e+00 : f32
      %c0_17 = arith.constant 0 : index
      %53 = memref.load %arg4[%c0_17] : memref<1xf32, #tpu.memory_space<smem>>
      memref.store %cst_16, %arg4[%c0_17] : memref<1xf32, #tpu.memory_space<smem>>
    } else {
    }
    %c0 = arith.constant 0 : index
    %c0_1 = arith.constant 0 : index
    %c0_2 = arith.constant 0 : index
    %3 = vector.load %arg1[%c0, %c0_1, %c0_2] : memref<6x16x16xf32, #tpu.memory_space<vmem>>, vector<6x16x16xf32>
    %cst = arith.constant 0.000000e+00 : f32
    %4 = vector.broadcast %cst : f32 to vector<6x1x16xf32>
    %cst_3 = arith.constant 0.000000e+00 : f32
    %5 = vector.broadcast %cst_3 : f32 to vector<6x16x1xf32>
    %6 = vector.extract_strided_slice %3 {offsets = [0, 1, 0], sizes = [6, 15, 16], strides = [1, 1, 1]} : vector<6x16x16xf32> to vector<6x15x16xf32>
    %7 = tpu.concatenate %6, %4 in 1 : vector<6x15x16xf32>, vector<6x1x16xf32> -> vector<6x16x16xf32>
    %8 = vector.extract_strided_slice %3 {offsets = [0, 0, 0], sizes = [6, 15, 16], strides = [1, 1, 1]} : vector<6x16x16xf32> to vector<6x15x16xf32>
    %9 = tpu.concatenate %4, %8 in 1 : vector<6x1x16xf32>, vector<6x15x16xf32> -> vector<6x16x16xf32>
    %10 = vector.extract_strided_slice %3 {offsets = [0, 0, 1], sizes = [6, 16, 15], strides = [1, 1, 1]} : vector<6x16x16xf32> to vector<6x16x15xf32>
    %11 = tpu.concatenate %10, %5 in 2 : vector<6x16x15xf32>, vector<6x16x1xf32> -> vector<6x16x16xf32>
    %12 = vector.extract_strided_slice %3 {offsets = [0, 0, 0], sizes = [6, 16, 15], strides = [1, 1, 1]} : vector<6x16x16xf32> to vector<6x16x15xf32>
    %13 = tpu.concatenate %5, %12 in 2 : vector<6x16x1xf32>, vector<6x16x15xf32> -> vector<6x16x16xf32>
    %14 = arith.subf %7, %9 : vector<6x16x16xf32>
    %15 = arith.subf %11, %13 : vector<6x16x16xf32>
    %16 = arith.mulf %14, %14 : vector<6x16x16xf32>
    %17 = arith.mulf %15, %15 : vector<6x16x16xf32>
    %18 = arith.addf %16, %17 : vector<6x16x16xf32>
    %cst_4 = arith.constant 9.99999997E-7 : f32
    %19 = vector.broadcast %cst_4 : f32 to vector<6x16x16xf32>
    %20 = arith.addf %18, %19 : vector<6x16x16xf32>
    %21 = math.sqrt %20 : vector<6x16x16xf32>
    %c0_5 = arith.constant 0 : index
    %c0_6 = arith.constant 0 : index
    %c0_7 = arith.constant 0 : index
    %22 = vector.load %arg2[%c0_5, %c0_6, %c0_7] : memref<6x16x16xf32, #tpu.memory_space<vmem>>, vector<6x16x16xf32>
    %cst_8 = arith.constant 0.000000e+00 : f32
    %23 = vector.broadcast %cst_8 : f32 to vector<6x1x16xf32>
    %cst_9 = arith.constant 0.000000e+00 : f32
    %24 = vector.broadcast %cst_9 : f32 to vector<6x16x1xf32>
    %25 = vector.extract_strided_slice %22 {offsets = [0, 1, 0], sizes = [6, 15, 16], strides = [1, 1, 1]} : vector<6x16x16xf32> to vector<6x15x16xf32>
    %26 = tpu.concatenate %25, %23 in 1 : vector<6x15x16xf32>, vector<6x1x16xf32> -> vector<6x16x16xf32>
    %27 = vector.extract_strided_slice %22 {offsets = [0, 0, 0], sizes = [6, 15, 16], strides = [1, 1, 1]} : vector<6x16x16xf32> to vector<6x15x16xf32>
    %28 = tpu.concatenate %23, %27 in 1 : vector<6x1x16xf32>, vector<6x15x16xf32> -> vector<6x16x16xf32>
    %29 = vector.extract_strided_slice %22 {offsets = [0, 0, 1], sizes = [6, 16, 15], strides = [1, 1, 1]} : vector<6x16x16xf32> to vector<6x16x15xf32>
    %30 = tpu.concatenate %29, %24 in 2 : vector<6x16x15xf32>, vector<6x16x1xf32> -> vector<6x16x16xf32>
    %31 = vector.extract_strided_slice %22 {offsets = [0, 0, 0], sizes = [6, 16, 15], strides = [1, 1, 1]} : vector<6x16x16xf32> to vector<6x16x15xf32>
    %32 = tpu.concatenate %24, %31 in 2 : vector<6x16x1xf32>, vector<6x16x15xf32> -> vector<6x16x16xf32>
    %33 = arith.subf %26, %28 : vector<6x16x16xf32>
    %34 = arith.subf %30, %32 : vector<6x16x16xf32>
    %35 = arith.mulf %33, %33 : vector<6x16x16xf32>
    %36 = arith.mulf %34, %34 : vector<6x16x16xf32>
    %37 = arith.addf %35, %36 : vector<6x16x16xf32>
    %cst_10 = arith.constant 9.99999997E-7 : f32
    %38 = vector.broadcast %cst_10 : f32 to vector<6x16x16xf32>
    %39 = arith.addf %37, %38 : vector<6x16x16xf32>
    %40 = math.sqrt %39 : vector<6x16x16xf32>
    %41 = arith.subf %21, %40 : vector<6x16x16xf32>
    %42 = math.absf %41 : vector<6x16x16xf32>
    %43 = vector.shape_cast %42 : vector<6x16x16xf32> to vector<1x6x16x16xf32>
    %cst_11 = arith.constant dense<0.000000e+00> : vector<1xf32>
    %44 = vector.multi_reduction <add>, %43, %cst_11 [1, 2, 3] : vector<1x6x16x16xf32> to vector<1xf32>
    %45 = vector.shape_cast %44 : vector<1xf32> to vector<1x1x1x1xf32>
    %46 = vector.extract %45[0, 0, 0, 0] : f32 from vector<1x1x1x1xf32>
    %c0_12 = arith.constant 0 : index
    %47 = memref.load %arg4[%c0_12] : memref<1xf32, #tpu.memory_space<smem>>
    %48 = arith.addf %47, %46 : f32
    %c0_13 = arith.constant 0 : index
    %49 = memref.load %arg4[%c0_13] : memref<1xf32, #tpu.memory_space<smem>>
    memref.store %48, %arg4[%c0_13] : memref<1xf32, #tpu.memory_space<smem>>
    %c0_i32_14 = arith.constant 0 : i32
    %50 = arith.cmpi eq, %arg0, %c0_i32_14 : i32
    %51 = arith.extui %50 : i1 to i32
    %c0_i32_15 = arith.constant 0 : i32
    %52 = arith.cmpi ne, %51, %c0_i32_15 : i32
    scf.if %52 {
      %c0_16 = arith.constant 0 : index
      %53 = memref.load %arg4[%c0_16] : memref<1xf32, #tpu.memory_space<smem>>
      %cst_17 = arith.constant 6.51041686E-4 : f32
      %54 = arith.mulf %53, %cst_17 : f32
      %c0_18 = arith.constant 0 : index
      %c0_19 = arith.constant 0 : index
      %55 = memref.load %arg3[%c0_18, %c0_19] : memref<1x1xf32, #tpu.memory_space<smem>>
      memref.store %54, %arg3[%c0_18, %c0_19] : memref<1x1xf32, #tpu.memory_space<smem>>
    } else {
    }
    return
  }
  func.func @transform_0(%arg0: i32) -> (i32, i32, i32) {
    %c0_i32 = arith.constant 0 : i32
    %c0_i32_0 = arith.constant 0 : i32
    %c0_i32_1 = arith.constant 0 : i32
    return %arg0, %c0_i32, %c0_i32_0 : i32, i32, i32
  }
  func.func @transform_1(%arg0: i32) -> (i32, i32, i32) {
    %c0_i32 = arith.constant 0 : i32
    %c0_i32_0 = arith.constant 0 : i32
    %c0_i32_1 = arith.constant 0 : i32
    return %arg0, %c0_i32, %c0_i32_0 : i32, i32, i32
  }
  func.func @transform_2(%arg0: i32) -> (i32, i32) {
    %c0_i32 = arith.constant 0 : i32
    %c0_i32_0 = arith.constant 0 : i32
    %c0_i32_1 = arith.constant 0 : i32
    return %c0_i32, %c0_i32_0 : i32, i32
  }
}

</mosaic_0001>

<bundles_post_ra>
// kernel: gradient_loss.1
= control target key start
LH: loop header
LB: loop body
LE: loop exit
PB: predicated region body
PF: predicated region fallthrough
CT: control target
= control target key end

     0   :  { %7 = vsyncpa [#allocation4], 0  ;;  %s1571_s0 = inlined_call_operand.hbm [shape: f32[6,16,16], index: 0, kind: input, shape index: {}]   ;;  %s1572_s1 = inlined_call_operand.hbm [shape: f32[6,16,16], index: 1, kind: input, shape index: {}]   ;;  %s1573_s2 = inlined_call_operand.hbm [shape: f32[1,1], index: 2, kind: output, shape index: {}]  }
   0x1   :  { %8 = vsyncpa [#allocation7], 0 }
   0x2   :  { %9 = vsyncpa [#allocation5], 0  ;;  %s946_s9 = smov [#allocation3]   ;;  %s886_s13 = scalar_lea.hbm %s1571_s0, 1536 }
   0x3   :  { %s15_s10 = sshll.u32 %s946_s9, 4  ;;  %p887_p0 = scmp.ne.s32.totalorder %s1571_s0, %s886_s13  ;;  %s16_s10 = int_to_ptr.vmem [resolvable:$true] %s15_s10 }
   0x4   :  { %p890_p1 = scmp.lt.u32.totalorder %s886_s13, %s1571_s0 }
   0x6   :  { %p892_p2 = pnand %p890_p1, %p887_p0 }
   0x8   :  { %895 = shalt.err (!%p892_p2)
}
   0x9   :  { %s896_s18 = scalar_lea.vmem %s16_s10, 1536  ;;  %p901_p4 = scmp.lt.s32.totalorder %s16_s10, %s16_s10 }
   0xa   :  { %p897_p3 = scmp.ne.s32.totalorder %s16_s10, %s896_s18  ;;  %p902_p5 = scmp.lt.s32.totalorder %s896_s18, %s896_s18 }
   0xc   :  { %p903_p6 = por %p902_p5, %p901_p4 }
   0xe   :  { %p904_p7 = pnand %p903_p6, %p897_p3 }
  0x10   :  { %907 = shalt.err (!%p904_p7)
}
  0x11   :  { %s947_s19 = smov 128   ;;  %s948_s20 = smov 8  }
  0x12   :  { %21 = dma.hbm_to_vmem [thread:$0]  %s1571_s0, 1536, %s16_s10, [#allocation4], %s947_s19, %s947_s19, %s948_s20  }
  0x13   :  { %s949_s23 = smov [#allocation6]   ;;  %s908_s27 = scalar_lea.hbm %s1572_s1, 1536 }
  0x14   :  { %s27_s24 = sshll.u32 %s949_s23, 4  ;;  %p909_p8 = scmp.ne.s32.totalorder %s1572_s1, %s908_s27  ;;  %s28_s24 = int_to_ptr.vmem [resolvable:$true] %s27_s24 }
  0x15   :  { %p912_p9 = scmp.lt.u32.totalorder %s908_s27, %s1572_s1 }
  0x17   :  { %p914_p10 = pnand %p912_p9, %p909_p8 }
  0x19   :  { %917 = shalt.err (!%p914_p10)
}
  0x1a   :  { %s918_s4 = scalar_lea.vmem %s28_s24, 1536  ;;  %p923_p12 = scmp.lt.s32.totalorder %s28_s24, %s28_s24 }
  0x1b   :  { %p919_p11 = scmp.ne.s32.totalorder %s28_s24, %s918_s4  ;;  %p924_p13 = scmp.lt.s32.totalorder %s918_s4, %s918_s4 }
  0x1d   :  { %p925_p0 = por %p924_p13, %p923_p12 }
  0x1f   :  { %p926_p1 = pnand %p925_p0, %p919_p11 }
  0x21   :  { %929 = shalt.err (!%p926_p1)
}
  0x22   :  { %33 = dma.hbm_to_vmem [thread:$0]  %s1572_s1, 1536, %s28_s24, [#allocation7], %s947_s19, %s947_s19, %s948_s20  }
  0x23   :  { %940 = dma.done.wait [#allocation4], 1536  }
  0x24   :  { %941 = vsyncadd [#allocation4], 4294965760 }
  0x25   :  { %942 = dma.done.wait [#allocation7], 1536  }
  0x26   :  { %943 = vsyncadd [#allocation7], 4294965760  ;;  %v46_v0 = vld [vmem:[#allocation3] sm:$0xff]  ;;  %s950_s6 = smov 1   ;;  %s951_s7 = smov 127   ;;  %v47_v1 = vld [vmem:[#allocation3 + $0x8] sm:$0xff] }
  0x27   :  { %193 = vrot.lane.b32.xlu1 %v46_v0, %s950_s6  ;;  %144 = vrot.lane.b32.xlu0 %v46_v0, %s951_s7  ;;  %v399_v2 = vld [vmem:[#allocation6 + $0x8] sm:$0xff]  ;;  %v398_v3 = vld [vmem:[#allocation6] sm:$0xff]  ;;  %vm70_vm0 = vcmask 1046528   ;;  %v71_v4 = vrot.slane %v46_v0, 1  ;;  %v108_v5 = vrot.slane %v46_v0, 7  ;;  %v72_v6 = vrot.slane %v47_v1, 1 }
  0x28   :  { %v109_v7 = vrot.slane %v47_v1, 7  ;;  %v423_v8 = vrot.slane %v399_v2, 1  ;;  %v459_v9 = vrot.slane %v399_v2, 7  ;;  %v458_v10 = vrot.slane %v398_v3, 7  ;;  %v48_v11 = vld [vmem:[#allocation3 + $0x10] sm:$0xff]  ;;  %v49_v12 = vld [vmem:[#allocation3 + $0x18] sm:$0xff] }
  0x29   :  { %vm107_vm1 = vcmask 1040384   ;;  %v422_v13 = vrot.slane %v398_v3, 1  ;;  %v74_v14 = vrot.slane %v48_v11, 1  ;;  %v111_v15 = vrot.slane %v48_v11, 7  ;;  %v400_v16 = vld [vmem:[#allocation6 + $0x10] sm:$0xff]  ;;  %v401_v18 = vld [vmem:[#allocation6 + $0x18] sm:$0xff] }
  0x2a   :  { %v75_v17 = vrot.slane %v49_v12, 1  ;;  %v425_v19 = vrot.slane %v400_v16, 1  ;;  %v461_v20 = vrot.slane %v400_v16, 7  ;;  %v112_v21 = vrot.slane %v49_v12, 7  ;;  %v50_v41 = vld [vmem:[#allocation3 + $0x20] sm:$0xff]  ;;  %v51_v46 = vld [vmem:[#allocation3 + $0x28] sm:$0xff] }
  0x2b   :  { %195 = vrot.lane.b32.xlu1 %v47_v1, %s950_s6  ;;  %146 = vrot.lane.b32.xlu0 %v47_v1, %s951_s7  ;;  %v426_v22 = vrot.slane %v401_v18, 1  ;;  %v73_v23 = vsel %vm70_vm0, %v71_v4, %v72_v6  ;;  %v138_v24 = vsel %vm107_vm1, 0.0, %v108_v5  ;;  %v101_v25 = vsel %vm70_vm0, %v72_v6, 0.0  ;;  %v402_v53 = vld [vmem:[#allocation6 + $0x20] sm:$0xff]  ;;  %v403_v55 = vld [vmem:[#allocation6 + $0x28] sm:$0xff]  ;;  %s930_s11 = scalar_lea.hbm %s1573_s2, 16 }
  0x2c   :  { %v110_v26 = vsel %vm107_vm1, %v108_v5, %v109_v7  ;;  %v1004_v27 = vsub.f32 %v73_v23, %v138_v24  ;;  %v452_v29 = vsel %vm70_vm0, %v423_v8, 0.0  ;;  %v460_v30 = vsel %vm107_vm1, %v458_v10, %v459_v9  ;;  %v52_v5 = vld [vmem:[#allocation3 + $0x30] sm:$0xff]  ;;  %v53_v7 = vld [vmem:[#allocation3 + $0x38] sm:$0xff]  ;;  %p931_p2 = scmp.ne.s32.totalorder %s1573_s2, %s930_s11  ;;  %p934_p3 = scmp.lt.u32.totalorder %s930_s11, %s1573_s2 }
  0x2d   :  { %v1006_v28 = vsub.f32 %v101_v25, %v110_v26  ;;  %v1010_v31 = vsub.f32 %v452_v29, %v460_v30  ;;  %v424_v32 = vsel %vm70_vm0, %v422_v13, %v423_v8  ;;  %v488_v33 = vsel %vm107_vm1, 0.0, %v458_v10  ;;  %v404_v13 = vld [vmem:[#allocation6 + $0x30] sm:$0xff] }
  0x2e   :  { %v76_v34 = vsel %vm70_vm0, %v74_v14, %v75_v17  ;;  %v462_v35 = vrot.slane %v401_v18, 7  ;;  %v1015_v36 = vsub.f32 %v424_v32, %v488_v33  ;;  %v139_v37 = vsel %vm107_vm1, 0.0, %v111_v15  ;;  %v54_v32 = vld [vmem:[#allocation3 + $0x40] sm:$0xff]  ;;  %p936_p4 = pnand %p934_p3, %p931_p2 }
  0x2f   :  { %496 = vrot.lane.b32.xlu1 %v399_v2, %s951_s7  ;;  %494 = vrot.lane.b32.xlu0 %v398_v3, %s951_s7  ;;  %v1020_v38 = vsub.f32 %v76_v34, %v139_v37  ;;  %v427_v39 = vsel %vm70_vm0, %v425_v19, %v426_v22  ;;  %v489_v40 = vsel %vm107_vm1, 0.0, %v461_v20  ;;  %v102_v43 = vsel %vm70_vm0, %v75_v17, 0.0  ;;  %v55_v34 = vld [vmem:[#allocation3 + $0x48] sm:$0xff] }
  0x30   :  { %v1024_v42 = vsub.f32 %v427_v39, %v489_v40  ;;  %v113_v44 = vsel %vm107_vm1, %v111_v15, %v112_v21  ;;  %v77_v45 = vrot.slane %v50_v41, 1  ;;  %v114_v48 = vrot.slane %v50_v41, 7  ;;  %v405_v15 = vld [vmem:[#allocation6 + $0x38] sm:$0xff] }
  0x31   :  { %v1028_v47 = vsub.f32 %v102_v43, %v113_v44  ;;  %v78_v49 = vrot.slane %v51_v46, 1  ;;  %v453_v50 = vsel %vm70_vm0, %v426_v22, 0.0  ;;  %v463_v51 = vsel %vm107_vm1, %v461_v20, %v462_v35 }
  0x32   :  { %v1034_v52 = vsub.f32 %v453_v50, %v463_v51  ;;  %v428_v54 = vrot.slane %v402_v53, 1  ;;  %v464_v56 = vrot.slane %v402_v53, 7  ;;  %v429_v57 = vrot.slane %v403_v55, 1  ;;  %v1098_v51 = vld [vmem:[#allocation6 + $0x40] sm:$0xff] }
  0x33   :  { %544 = vrot.lane.b32.xlu1 %v399_v2, %s950_s6  ;;  %542 = vrot.lane.b32.xlu0 %v398_v3, %s950_s6  ;;  %v79_v58 = vsel %vm70_vm0, %v77_v45, %v78_v49  ;;  %v140_v59 = vsel %vm107_vm1, 0.0, %v114_v48  ;;  %v115_v61 = vrot.slane %v51_v46, 7  ;;  %v465_v1 = vrot.slane %v403_v55, 7 }
  0x34   :  { %v1040_v60 = vsub.f32 %v79_v58, %v140_v59  ;;  %v430_v62 = vsel %vm70_vm0, %v428_v54, %v429_v57  ;;  %v490_v63 = vsel %vm107_vm1, 0.0, %v464_v56  ;;  %v103_v2 = vsel %vm70_vm0, %v78_v49, 0.0  ;;  %v1112_v54 = vld [vmem:[#allocation3 + $0x50] sm:$0xff] }
  0x35   :  { %v1046_v0 = vsub.f32 %v430_v62, %v490_v63  ;;  %v116_v3 = vsel %vm107_vm1, %v114_v48, %v115_v61  ;;  %v80_v6 = vrot.slane %v52_v5, 1  ;;  %v117_v8 = vrot.slane %v52_v5, 7 }
  0x36   :  { %v1052_v4 = vsub.f32 %v103_v2, %v116_v3  ;;  %v81_v9 = vrot.slane %v53_v7, 1  ;;  %v454_v10 = vsel %vm70_vm0, %v429_v57, 0.0  ;;  %v431_v14 = vrot.slane %v404_v13, 1  ;;  %v1130_v57 = vld [vmem:[#allocation6 + $0x58] sm:$0xff] }
  0x37   :  { %197 = vrot.lane.b32.xlu1 %v48_v11, %s950_s6  ;;  %148 = vrot.lane.b32.xlu0 %v48_v11, %s951_s7  ;;  %v466_v11 = vsel %vm107_vm1, %v464_v56, %v465_v1  ;;  %v432_v17 = vrot.slane %v405_v15, 1  ;;  %v141_v19 = vsel %vm107_vm1, 0.0, %v117_v8  ;;  %v118_v21 = vrot.slane %v53_v7, 7  ;;  %v1124_v56 = vld [vmem:[#allocation3 + $0x58] sm:$0xff] }
  0x38   :  { %v468_v25 = vrot.slane %v405_v15, 7  ;;  %v104_v26 = vsel %vm70_vm0, %v81_v9, 0.0  ;;  %v83_v33 = vrot.slane %v54_v32, 1  ;;  %v120_v35 = vrot.slane %v54_v32, 7 }
  0x39   :  { %v433_v22 = vsel %vm70_vm0, %v431_v14, %v432_v17  ;;  %v119_v29 = vsel %vm107_vm1, %v117_v8, %v118_v21  ;;  %v84_v37 = vrot.slane %v55_v34, 1  ;;  %v455_v39 = vsel %vm70_vm0, %v432_v17, 0.0 }
  0x3a   :  { %v1076_v30 = vsub.f32 %v104_v26, %v119_v29  ;;  %v142_v44 = vsel %vm107_vm1, 0.0, %v120_v35  ;;  %vm229_vm2 = vcmask 7168   ;;  %vm180_vm3 = vcmask 121856  }
  0x3b   :  { %546 = vrot.lane.b32.xlu1 %v400_v16, %s950_s6  ;;  %498 = vrot.lane.b32.xlu0 %v400_v16, %s951_s7  ;;  %v467_v16 = vrot.slane %v404_v13, 7  ;;  %v85_v43 = vsel %vm70_vm0, %v83_v33, %v84_v37  ;;  %v105_v48 = vsel %vm70_vm0, %v84_v37, 0.0  ;;  %v266_v1 = vmul.f32 %v1004_v27, %v1004_v27 }
  0x3c   :  { %v1088_v45 = vsub.f32 %v85_v43, %v142_v44  ;;  %v474_v29 = vrot.slane %v1130_v57, 7  ;;  %vm770_vm10 = vcmask 130048  }
  0x3d   :  { %v491_v23 = vsel %vm107_vm1, 0.0, %v467_v16  ;;  %v469_v40 = vsel %vm107_vm1, %v467_v16, %v468_v25  ;;  %v470_v16 = vrot.slane %v1098_v51, 7  ;;  %v438_v25 = vrot.slane %v1130_v57, 1 }
  0x3e   :  { %v1070_v24 = vsub.f32 %v433_v22, %v491_v23  ;;  %v124_v23 = vrot.slane %v1124_v56, 7 }
  0x3f   :  { %199 = vrot.lane.b32.xlu1 %v49_v12, %s950_s6  ;;  %150 = vrot.lane.b32.xlu0 %v49_v12, %s951_s7  ;;  %v1058_v12 = vsub.f32 %v454_v10, %v466_v11  ;;  %v267_v10 = vmul.f32 %v1006_v28, %v1006_v28  ;;  %v87_v28 = vrot.slane %v1124_v56, 1 }
  0x43   :  { %548 = vrot.lane.b32.xlu1 %v401_v18, %s950_s6  ;;  %500 = vrot.lane.b32.xlu0 %v401_v18, %s951_s7  ;;  %v82_v18 = vsel %vm70_vm0, %v80_v6, %v81_v9 }
  0x44   :  { %v1064_v20 = vsub.f32 %v82_v18, %v141_v19  ;;  %v86_v18 = vrot.slane %v1112_v54, 1  ;;  %v123_v19 = vrot.slane %v1112_v54, 7 }
  0x47   :  { %201 = vrot.lane.b32.xlu1 %v50_v41, %s950_s6  ;;  %152 = vrot.lane.b32.xlu0 %v50_v41, %s951_s7  ;;  %v1082_v41 = vsub.f32 %v455_v39, %v469_v40 }
  0x4b   :  { %550 = vrot.lane.b32.xlu1 %v402_v53, %s950_s6  ;;  %502 = vrot.lane.b32.xlu0 %v402_v53, %s951_s7  ;;  %v1106_v53 = vld [vmem:[#allocation6 + $0x48] sm:$0xff] }
  0x4c   :  { %v435_v27 = vrot.slane %v1106_v53, 1  ;;  %v471_v17 = vrot.slane %v1106_v53, 7 }
  0x4f   :  { %203 = vrot.lane.b32.xlu1 %v51_v46, %s950_s6  ;;  %154 = vrot.lane.b32.xlu0 %v51_v46, %s951_s7  ;;  %v121_v46 = vrot.slane %v55_v34, 7 }
  0x51   :  { %v122_v49 = vsel %vm107_vm1, %v120_v35, %v121_v46 }
  0x52   :  { %v1096_v50 = vsub.f32 %v105_v48, %v122_v49  ;;  %v614_v48 = vmul.f32 %v1015_v36, %v1015_v36 }
  0x53   :  { %552 = vrot.lane.b32.xlu1 %v403_v55, %s950_s6  ;;  %504 = vrot.lane.b32.xlu0 %v403_v55, %s951_s7  ;;  %v1118_v55 = vld [vmem:[#allocation6 + $0x50] sm:$0xff] }
  0x54   :  { %v437_v21 = vrot.slane %v1118_v55, 1  ;;  %v473_v22 = vrot.slane %v1118_v55, 7 }
  0x57   :  { %205 = vrot.lane.b32.xlu1 %v52_v5, %s950_s6  ;;  %156 = vrot.lane.b32.xlu0 %v52_v5, %s951_s7 }
  0x5b   :  { %554 = vrot.lane.b32.xlu1 %v404_v13, %s950_s6  ;;  %506 = vrot.lane.b32.xlu0 %v404_v13, %s951_s7 }
  0x5f   :  { %207 = vrot.lane.b32.xlu1 %v53_v7, %s950_s6  ;;  %158 = vrot.lane.b32.xlu0 %v53_v7, %s951_s7 }
  0x63   :  { %556 = vrot.lane.b32.xlu1 %v405_v15, %s950_s6  ;;  %508 = vrot.lane.b32.xlu0 %v405_v15, %s951_s7  ;;  %v434_v15 = vrot.slane %v1098_v51, 1 }
  0x67   :  { %209 = vrot.lane.b32.xlu1 %v54_v32, %s950_s6  ;;  %160 = vrot.lane.b32.xlu0 %v54_v32, %s951_s7 }
  0x6b   :  { %558 = vrot.lane.b32.xlu1 %v1098_v51, %s950_s6  ;;  %510 = vrot.lane.b32.xlu0 %v1098_v51, %s951_s7  ;;  %v268_v51 = vmul.f32 %v1020_v38, %v1020_v38 }
  0x6f   :  { %211 = vrot.lane.b32.xlu1 %v55_v34, %s950_s6  ;;  %162 = vrot.lane.b32.xlu0 %v55_v34, %s951_s7  ;;  %v615_v34 = vmul.f32 %v1010_v31, %v1010_v31  ;;  %v1172_v31 = vmul.f32 %v1024_v42, %v1024_v42  ;;  %v1189_v42 = vmul.f32 %v1046_v0, %v1046_v0  ;;  %v456_v0 = vsel %vm70_vm0, %v435_v27, 0.0 }
  0x73   :  { %560 = vrot.lane.b32.xlu1 %v1106_v53, %s950_s6  ;;  %512 = vrot.lane.b32.xlu0 %v1106_v53, %s951_s7  ;;  %v1176_v53 = vmul.f32 %v1028_v47, %v1028_v47 }
  0x77   :  { %213 = vrot.lane.b32.xlu1 %v1112_v54, %s950_s6  ;;  %164 = vrot.lane.b32.xlu0 %v1112_v54, %s951_s7 }
  0x7b   :  { %562 = vrot.lane.b32.xlu1 %v1118_v55, %s950_s6  ;;  %514 = vrot.lane.b32.xlu0 %v1118_v55, %s951_s7 }
  0x7f   :  { %215 = vrot.lane.b32.xlu1 %v1124_v56, %s950_s6  ;;  %166 = vrot.lane.b32.xlu0 %v1124_v56, %s951_s7 }
  0x83   :  { %564 = vrot.lane.b32.xlu1 %v1130_v57, %s950_s6  ;;  %516 = vrot.lane.b32.xlu0 %v1130_v57, %s951_s7 }
  0x99   :  { %v194_v58 = vpop.permute.xlu1 %193  ;;  %v145_v59 = vpop.permute.xlu0 %144 }
  0x9a   :  { %v230_v61 = vsel %vm229_vm2, 0.0, %v194_v58  ;;  %v181_v62 = vsel %vm180_vm3, %v145_v59, 0.0  ;;  %v1180_v58 = vmul.f32 %v1034_v52, %v1034_v52  ;;  %v1184_v59 = vmul.f32 %v1040_v60, %v1040_v60 }
  0x9b   :  { %v254_v63 = vsub.f32 %v181_v62, %v230_v61  ;;  %v1196_v60 = vmul.f32 %v1052_v4, %v1052_v4 }
  0x9d   :  { %v278_v2 = vmul.f32 %v254_v63, %v254_v63  ;;  %v196_v3 = vpop.permute.xlu1 %195  ;;  %v147_v5 = vpop.permute.xlu0 %146 }
  0x9e   :  { %v231_v6 = vsel %vm229_vm2, 0.0, %v196_v3  ;;  %v182_v7 = vsel %vm180_vm3, %v147_v5, 0.0  ;;  %v436_v3 = vsel %vm70_vm0, %v434_v15, %v435_v27  ;;  %v492_v5 = vsel %vm107_vm1, 0.0, %v470_v16 }
  0x9f   :  { %v290_v8 = vadd.f32 %v278_v2, %v266_v1  ;;  %v255_v9 = vsub.f32 %v182_v7, %v231_v6  ;;  %v472_v6 = vsel %vm107_vm1, %v470_v16, %v471_v17  ;;  %v88_v7 = vsel %vm70_vm0, %v86_v18, %v87_v28 }
  0xa0   :  { %v1216_v16 = vmul.f32 %v1058_v12, %v1058_v12  ;;  %v1220_v27 = vmul.f32 %v1064_v20, %v1064_v20  ;;  %v1225_v17 = vmul.f32 %v1070_v24, %v1070_v24  ;;  %v1229_v18 = vmul.f32 %v1076_v30, %v1076_v30 }
  0xa1   :  { %v279_v11 = vmul.f32 %v255_v9, %v255_v9  ;;  %v497_v13 = vpop.permute.xlu1 %496  ;;  %v495_v14 = vpop.permute.xlu0 %494  ;;  %v1156_v32 = vadd.f32 1e-06, %v290_v8  ;;  %v598_v12 = vsub.f32 %v436_v3, %v492_v5  ;;  %v439_v24 = vsel %vm70_vm0, %v437_v21, %v438_v25 }
  0xa2   :  { %v531_v33 = vsel %vm180_vm3, %v497_v13, 0.0  ;;  %v530_v40 = vsel %vm180_vm3, %v495_v14, 0.0  ;;  %v143_v13 = vsel %vm107_vm1, 0.0, %v123_v19  ;;  %v493_v30 = vsel %vm107_vm1, 0.0, %v473_v22 }
  0xa3   :  { %v291_v26 = vadd.f32 %v279_v11, %v267_v10  ;;  %838 = vrsqrt.f32 %v1156_v32  ;;  %v252_v20 = vsub.f32 %v88_v7, %v143_v13  ;;  %vm316_vm4 = vcmp.eq.f32.partialorder %v1156_v32, inf }
  0xa4   :  { %vm318_vm5 = vcmp.eq.f32.partialorder %v1156_v32, 0.0 }
  0xa5   :  { %v545_v35 = vpop.permute.xlu1 %544  ;;  %v543_v37 = vpop.permute.xlu0 %542  ;;  %v1161_v39 = vadd.f32 1e-06, %v291_v26  ;;  %v1233_v26 = vmul.f32 %v1082_v41, %v1082_v41  ;;  %v1268_v54 = vmul.f32 %v252_v20, %v252_v20 }
  0xa6   :  { %v579_v43 = vsel %vm229_vm2, 0.0, %v545_v35  ;;  %v578_v44 = vsel %vm229_vm2, 0.0, %v543_v37 }
  0xa7   :  { %v603_v46 = vsub.f32 %v531_v33, %v579_v43  ;;  %v602_v49 = vsub.f32 %v530_v40, %v578_v44  ;;  %840 = vrsqrt.f32 %v1161_v39  ;;  %v599_v33 = vsub.f32 %v456_v0, %v472_v6 }
  0xa8   :  { %v106_v44 = vsel %vm70_vm0, %v87_v28, 0.0  ;;  %v1264_v28 = vmul.f32 %v1096_v50, %v1096_v50  ;;  %vm323_vm6 = vcmp.eq.f32.partialorder %v1161_v39, inf  ;;  %vm325_vm11 = vcmp.eq.f32.partialorder %v1161_v39, 0.0 }
  0xa9   :  { %v627_v36 = vmul.f32 %v603_v46, %v603_v46  ;;  %v626_v38 = vmul.f32 %v602_v49, %v602_v49  ;;  %v198_v61 = vpop.permute.xlu1 %197  ;;  %v149_v62 = vpop.permute.xlu0 %148  ;;  %v125_v46 = vsel %vm107_vm1, %v123_v19, %v124_v23  ;;  %v1266_v56 = vmul.f32 %v599_v33, %v599_v33 }
  0xaa   :  { %v232_v47 = vsel %vm229_vm2, 0.0, %v198_v61  ;;  %v183_v52 = vsel %vm180_vm3, %v149_v62, 0.0  ;;  %v1260_v61 = vmul.f32 %v598_v12, %v598_v12  ;;  %v600_v62 = vsub.f32 %v439_v24, %v493_v30 }
  0xab   :  { %v639_v63 = vadd.f32 %v627_v36, %v615_v34  ;;  %v638_v1 = vadd.f32 %v626_v38, %v614_v48  ;;  %v256_v2 = vsub.f32 %v183_v52, %v232_v47  ;;  %v1258_v36 = vmul.f32 %v1088_v45, %v1088_v45 }
  0xac   :  { %v253_v45 = vsub.f32 %v106_v44, %v125_v46 }
  0xad   :  { %v1205_v8 = vadd.f32 1e-06, %v639_v63  ;;  %v1207_v9 = vadd.f32 1e-06, %v638_v1  ;;  %v280_v4 = vmul.f32 %v256_v2, %v256_v2  ;;  %v547_v10 = vpop.permute.xlu1 %546  ;;  %v499_v11 = vpop.permute.xlu0 %498  ;;  %v319_v63 = vand.u32 2147483648, %v1156_v32 }
  0xae   :  { %v580_v14 = vsel %vm229_vm2, 0.0, %v547_v10  ;;  %v532_v15 = vsel %vm180_vm3, %v499_v11, 0.0  ;;  %v839_v48 = vpop.eup %838 }
  0xaf   :  { %842 = vrsqrt.f32 %v1205_v8  ;;  %v292_v34 = vadd.f32 %v280_v4, %v268_v51  ;;  %v604_v35 = vsub.f32 %v532_v15, %v580_v14  ;;  %v315_v47 = vmul.f32 %v839_v48, %v1156_v32 }
  0xb0   :  { %844 = vrsqrt.f32 %v1207_v9  ;;  %v326_v4 = vand.u32 2147483648, %v1161_v39  ;;  %vm671_vm7 = vcmp.eq.f32.partialorder %v1205_v8, inf  ;;  %vm673_vm8 = vcmp.eq.f32.partialorder %v1205_v8, 0.0 }
  0xb1   :  { %v200_v37 = vpop.permute.xlu1 %199  ;;  %v151_v40 = vpop.permute.xlu0 %150  ;;  %v1254_v21 = vadd.f32 1e-06, %v292_v34  ;;  %v628_v49 = vmul.f32 %v604_v35, %v604_v35  ;;  %v317_v14 = vsel %vm316_vm4, %v1156_v32, %v315_v47  ;;  %vm664_vm9 = vcmp.eq.f32.partialorder %v1207_v9, inf }
  0xb2   :  { %v233_v41 = vsel %vm229_vm2, 0.0, %v200_v37  ;;  %v184_v43 = vsel %vm180_vm3, %v151_v40, 0.0  ;;  %v841_v38 = vpop.eup %840  ;;  %v667_v33 = vand.u32 2147483648, %v1207_v9  ;;  %vm666_vm12 = vcmp.eq.f32.partialorder %v1207_v9, 0.0 }
  0xb3   :  { %v257_v51 = vsub.f32 %v184_v43, %v233_v41  ;;  %846 = vrsqrt.f32 %v1254_v21  ;;  %v640_v52 = vadd.f32 %v628_v49, %v1172_v31  ;;  %v322_v1 = vmul.f32 %v841_v38, %v1161_v39 }
  0xb4   :  { %v674_v31 = vand.u32 2147483648, %v1205_v8  ;;  %v320_v44 = vsel %vm318_vm5, %v319_v63, %v317_v14  ;;  %v1316_v63 = vmul.f32 %v600_v62, %v600_v62  ;;  %vm330_vm13 = vcmp.eq.f32.partialorder %v1254_v21, inf }
  0xb5   :  { %v549_v19 = vpop.permute.xlu1 %548  ;;  %v501_v23 = vpop.permute.xlu0 %500  ;;  %v281_v50 = vmul.f32 %v257_v51, %v257_v51  ;;  %v1280_v5 = vadd.f32 1e-06, %v640_v52 }
  0xb6   :  { %v581_v2 = vsel %vm229_vm2, 0.0, %v549_v19  ;;  %v533_v3 = vsel %vm180_vm3, %v501_v23, 0.0 }
  0xb7   :  { %v293_v0 = vadd.f32 %v281_v50, %v1176_v53  ;;  %v605_v6 = vsub.f32 %v533_v3, %v581_v2  ;;  %848 = vrsqrt.f32 %v1280_v5  ;;  %v324_v53 = vsel %vm323_vm6, %v1161_v39, %v322_v1 }
  0xb8   :  { %v327_v46 = vsel %vm325_vm11, %v326_v4, %v324_v53  ;;  %v1318_v1 = vmul.f32 %v253_v45, %v253_v45  ;;  %v475_v2 = vsel %vm107_vm1, %v473_v22, %v474_v29  ;;  %vm678_vm14 = vcmp.eq.f32.partialorder %v1280_v5, inf }
  0xb9   :  { %v843_v7 = vpop.eup %842  ;;  %v202_v10 = vpop.permute.xlu1 %201  ;;  %v629_v20 = vmul.f32 %v605_v6, %v605_v6  ;;  %v1299_v35 = vadd.f32 1e-06, %v293_v0  ;;  %vm680_vm15 = vcmp.eq.f32.partialorder %v1280_v5, 0.0 }
  0xba   :  { %v153_v11 = vpop.permute.xlu0 %152  ;;  %v845_v13 = vpop.eup %844  ;;  %v670_v15 = vmul.f32 %v843_v7, %v1205_v8  ;;  %v234_v37 = vsel %vm229_vm2, 0.0, %v202_v10 }
  0xbb   :  { %v663_v12 = vmul.f32 %v845_v13, %v1207_v9  ;;  %v185_v40 = vsel %vm180_vm3, %v153_v11, 0.0  ;;  %v641_v49 = vadd.f32 %v629_v20, %v1180_v58  ;;  %850 = vrsqrt.f32 %v1299_v35 }
  0xbc   :  { %v672_v34 = vsel %vm671_vm7, %v1205_v8, %v670_v15  ;;  %v258_v51 = vsub.f32 %v185_v40, %v234_v37  ;;  %v457_v58 = vsel %vm70_vm0, %v438_v25, 0.0  ;;  %v333_v25 = vand.u32 2147483648, %v1254_v21 }
  0xbd   :  { %v675_v24 = vsel %vm673_vm8, %v674_v31, %v672_v34  ;;  %v665_v30 = vsel %vm664_vm9, %v1207_v9, %v663_v12  ;;  %v551_v41 = vpop.permute.xlu1 %550  ;;  %v847_v19 = vpop.eup %846  ;;  %v1314_v23 = vadd.f32 1e-06, %v641_v49  ;;  %vm332_vm0 = vcmp.eq.f32.partialorder %v1254_v21, 0.0 }
  0xbe   :  { %v503_v43 = vpop.permute.xlu0 %502  ;;  %v668_v48 = vsel %vm666_vm12, %v667_v33, %v665_v30  ;;  %v582_v38 = vsel %vm229_vm2, 0.0, %v551_v41  ;;  %v747_v47 = vsub.f32 %v327_v46, %v675_v24  ;;  %v282_v52 = vmul.f32 %v258_v51, %v258_v51 }
  0xbf   :  { %v534_v39 = vsel %vm180_vm3, %v503_v43, 0.0  ;;  %v746_v8 = vsub.f32 %v320_v44, %v668_v48  ;;  %852 = vrsqrt.f32 %v1314_v23  ;;  %v329_v62 = vmul.f32 %v847_v19, %v1254_v21 }
  0xc0   :  { %v606_v9 = vsub.f32 %v534_v39, %v582_v38  ;;  %v294_v45 = vadd.f32 %v282_v52, %v1184_v59  ;;  %v759_v57 = vand.u32 2147483647, %v747_v47  ;;  %v681_v33 = vand.u32 2147483648, %v1280_v5 }
  0xc1   :  { %v204_v32 = vpop.permute.xlu1 %203  ;;  %v758_v3 = vand.u32 2147483647, %v746_v8  ;;  %v849_v7 = vpop.eup %848  ;;  %v331_v53 = vsel %vm330_vm13, %v1254_v21, %v329_v62  ;;  %v1354_v24 = vsub.f32 %v457_v58, %v475_v2  ;;  %vm337_vm1 = vcmp.eq.f32.partialorder %v1299_v35, inf }
  0xc2   :  { %v155_v50 = vpop.permute.xlu0 %154  ;;  %v630_v0 = vmul.f32 %v606_v9, %v606_v9  ;;  %v235_v6 = vsel %vm229_vm2, 0.0, %v204_v32  ;;  %v677_v55 = vmul.f32 %v849_v7, %v1280_v5  ;;  %v1337_v31 = vadd.f32 1e-06, %v294_v45 }
  0xc3   :  { %v186_v4 = vsel %vm180_vm3, %v155_v50, 0.0  ;;  %v771_v14 = vsel %vm770_vm10, %v758_v3, 0.0  ;;  %v772_v15 = vsel %vm770_vm10, %v759_v57, 0.0  ;;  %v340_v44 = vand.u32 2147483648, %v1299_v35 }
  0xc4   :  { %v642_v22 = vadd.f32 %v630_v0, %v1189_v42  ;;  %v259_v29 = vsub.f32 %v186_v4, %v235_v6  ;;  %v679_v12 = vsel %vm678_vm14, %v1280_v5, %v677_v55  ;;  %854 = vrsqrt.f32 %v1337_v31 }
  0xc5   :  { %v553_v10 = vpop.permute.xlu1 %552  ;;  %v682_v30 = vsel %vm680_vm15, %v681_v33, %v679_v12  ;;  %v1356_v41 = vadd.f32 %v772_v15, %v771_v14  ;;  %v851_v43 = vpop.eup %850  ;;  %v334_v5 = vsel %vm332_vm0, %v333_v25, %v331_v53  ;;  %vm339_vm4 = vcmp.eq.f32.partialorder %v1299_v35, 0.0 }
  0xc6   :  { %v505_v59 = vpop.permute.xlu0 %504  ;;  %v583_v11 = vsel %vm229_vm2, 0.0, %v553_v10  ;;  %v1351_v42 = vadd.f32 1e-06, %v642_v22  ;;  %v283_v20 = vmul.f32 %v259_v29, %v259_v29  ;;  %vm685_vm5 = vcmp.eq.f32.partialorder %v1314_v23, inf }
  0xc7   :  { %v535_v13 = vsel %vm180_vm3, %v505_v59, 0.0  ;;  %vm687_vm6 = vcmp.eq.f32.partialorder %v1314_v23, 0.0  ;;  %v748_v39 = vsub.f32 %v334_v5, %v682_v30  ;;  %v336_v8 = vmul.f32 %v851_v43, %v1299_v35 }
  0xc8   :  { %v607_v34 = vsub.f32 %v535_v13, %v583_v11  ;;  %856 = vrsqrt.f32 %v1351_v42  ;;  %v295_v46 = vadd.f32 %v283_v20, %v1196_v60  ;;  %v688_v32 = vand.u32 2147483648, %v1314_v23 }
  0xc9   :  { %v206_v37 = vpop.permute.xlu1 %205  ;;  %v853_v51 = vpop.eup %852  ;;  %vm344_vm7 = vcmp.eq.f32.partialorder %v1337_v31, inf  ;;  %v347_v45 = vand.u32 2147483648, %v1337_v31  ;;  %vm346_vm8 = vcmp.eq.f32.partialorder %v1337_v31, 0.0  ;;  %v338_v7 = vsel %vm337_vm1, %v1299_v35, %v336_v8 }
  0xca   :  { %v157_v40 = vpop.permute.xlu0 %156  ;;  %v631_v21 = vmul.f32 %v607_v34, %v607_v34  ;;  %v236_v48 = vsel %vm229_vm2, 0.0, %v206_v37  ;;  %v684_v19 = vmul.f32 %v853_v51, %v1314_v23  ;;  %v1369_v9 = vadd.f32 1e-06, %v295_v46 }
  0xcb   :  { %v187_v49 = vsel %vm180_vm3, %v157_v40, 0.0  ;;  %vm692_vm9 = vcmp.eq.f32.partialorder %v1351_v42, inf  ;;  %v695_v10 = vand.u32 2147483648, %v1351_v42  ;;  %v341_v15 = vsel %vm339_vm4, %v340_v44, %v338_v7 }
  0xcc   :  { %v260_v38 = vsub.f32 %v187_v49, %v236_v48  ;;  %v643_v60 = vadd.f32 %v631_v21, %v1216_v16  ;;  %858 = vrsqrt.f32 %v1369_v9  ;;  %v686_v16 = vsel %vm685_vm5, %v1314_v23, %v684_v19 }
  0xcd   :  { %v555_v47 = vpop.permute.xlu1 %554  ;;  %v689_v13 = vsel %vm687_vm6, %v688_v32, %v686_v16  ;;  %vm694_vm11 = vcmp.eq.f32.partialorder %v1351_v42, 0.0  ;;  %v760_v53 = vand.u32 2147483647, %v748_v39  ;;  %vm351_vm12 = vcmp.eq.f32.partialorder %v1369_v9, inf }
  0xce   :  { %v507_v52 = vpop.permute.xlu0 %506  ;;  %v284_v50 = vmul.f32 %v260_v38, %v260_v38  ;;  %v584_v58 = vsel %vm229_vm2, 0.0, %v555_v47  ;;  %v1377_v3 = vadd.f32 1e-06, %v643_v60  ;;  %v855_v6 = vpop.eup %854  ;;  %v749_v35 = vsub.f32 %v341_v15, %v689_v13 }
  0xcf   :  { %v536_v2 = vsel %vm180_vm3, %v507_v52, 0.0  ;;  %v343_v55 = vmul.f32 %v855_v6, %v1337_v31  ;;  %vm353_vm13 = vcmp.eq.f32.partialorder %v1369_v9, 0.0  ;;  %v354_v46 = vand.u32 2147483648, %v1369_v9 }
  0xd0   :  { %v608_v62 = vsub.f32 %v536_v2, %v584_v58  ;;  %v296_v0 = vadd.f32 %v284_v50, %v1220_v27  ;;  %860 = vrsqrt.f32 %v1377_v3  ;;  %vm699_vm14 = vcmp.eq.f32.partialorder %v1377_v3, inf }
  0xd1   :  { %v208_v4 = vpop.permute.xlu1 %207  ;;  %v345_v23 = vsel %vm344_vm7, %v1337_v31, %v343_v55  ;;  %vm701_vm15 = vcmp.eq.f32.partialorder %v1377_v3, 0.0  ;;  %v774_v52 = vsel %vm770_vm10, %v760_v53, 0.0  ;;  %v702_v50 = vand.u32 2147483648, %v1377_v3 }
  0xd2   :  { %v632_v25 = vmul.f32 %v608_v62, %v608_v62  ;;  %v159_v57 = vpop.permute.xlu0 %158  ;;  %v1391_v22 = vadd.f32 1e-06, %v296_v0  ;;  %v237_v27 = vsel %vm229_vm2, 0.0, %v208_v4  ;;  %v857_v14 = vpop.eup %856  ;;  %v348_v5 = vsel %vm346_vm8, %v347_v45, %v345_v23 }
  0xd3   :  { %v188_v29 = vsel %vm180_vm3, %v159_v57, 0.0  ;;  %v691_v12 = vmul.f32 %v857_v14, %v1351_v42  ;;  %v775_v4 = vadd.f32 %v774_v52, %v1356_v41 }
  0xd4   :  { %v644_v59 = vadd.f32 %v632_v25, %v1225_v17  ;;  %v261_v11 = vsub.f32 %v188_v29, %v237_v27  ;;  %862 = vrsqrt.f32 %v1391_v22  ;;  %vm358_vm0 = vcmp.eq.f32.partialorder %v1391_v22, inf }
  0xd5   :  { %v557_v34 = vpop.permute.xlu1 %556  ;;  %v693_v44 = vsel %vm692_vm9, %v1351_v42, %v691_v12  ;;  %vm360_vm1 = vcmp.eq.f32.partialorder %v1391_v22, 0.0  ;;  %v361_v45 = vand.u32 2147483648, %v1391_v22 }
  0xd6   :  { %v1404_v33 = vadd.f32 1e-06, %v644_v59  ;;  %v285_v20 = vmul.f32 %v261_v11, %v261_v11  ;;  %v509_v17 = vpop.permute.xlu0 %508  ;;  %v585_v37 = vsel %vm229_vm2, 0.0, %v557_v34  ;;  %v696_v21 = vsel %vm694_vm11, %v695_v10, %v693_v44  ;;  %v859_v48 = vpop.eup %858 }
  0xd7   :  { %v537_v40 = vsel %vm180_vm3, %v509_v17, 0.0  ;;  %v750_v39 = vsub.f32 %v348_v5, %v696_v21  ;;  %v350_v8 = vmul.f32 %v859_v48, %v1369_v9  ;;  %v761_v59 = vand.u32 2147483647, %v749_v35 }
  0xd8   :  { %864 = vrsqrt.f32 %v1404_v33  ;;  %v297_v30 = vadd.f32 %v285_v20, %v1229_v18  ;;  %v609_v43 = vsub.f32 %v537_v40, %v585_v37  ;;  %vm706_vm4 = vcmp.eq.f32.partialorder %v1404_v33, inf }
  0xd9   :  { %v210_v18 = vpop.permute.xlu1 %209  ;;  %vm708_vm5 = vcmp.eq.f32.partialorder %v1404_v33, 0.0  ;;  %v709_v17 = vand.u32 2147483648, %v1404_v33  ;;  %v762_v40 = vand.u32 2147483647, %v750_v39 }
  0xda   :  { %v1423_v49 = vadd.f32 1e-06, %v297_v30  ;;  %v633_v51 = vmul.f32 %v609_v43, %v609_v43  ;;  %v161_v38 = vpop.permute.xlu0 %160  ;;  %v238_v31 = vsel %vm229_vm2, 0.0, %v210_v18  ;;  %v861_v60 = vpop.eup %860 }
  0xdb   :  { %v189_v19 = vsel %vm180_vm3, %v161_v38, 0.0  ;;  %v698_v32 = vmul.f32 %v861_v60, %v1377_v3 }
  0xdc   :  { %866 = vrsqrt.f32 %v1423_v49  ;;  %v645_v42 = vadd.f32 %v633_v51, %v1233_v26  ;;  %v262_v47 = vsub.f32 %v189_v19, %v238_v31  ;;  %v352_v26 = vsel %vm351_vm12, %v1369_v9, %v350_v8 }
  0xdd   :  { %v559_v62 = vpop.permute.xlu1 %558  ;;  %v700_v25 = vsel %vm699_vm14, %v1377_v3, %v698_v32  ;;  %v355_v29 = vsel %vm353_vm13, %v354_v46, %v352_v26  ;;  %vm365_vm6 = vcmp.eq.f32.partialorder %v1423_v49, inf  ;;  %v776_v46 = vsel %vm770_vm10, %v761_v59, 0.0 }
  0xde   :  { %v1437_v58 = vadd.f32 1e-06, %v645_v42  ;;  %v286_v2 = vmul.f32 %v262_v47, %v262_v47  ;;  %v511_v16 = vpop.permute.xlu0 %510  ;;  %v863_v0 = vpop.eup %862  ;;  %v586_v6 = vsel %vm229_vm2, 0.0, %v559_v62  ;;  %v703_v10 = vsel %vm701_vm15, %v702_v50, %v700_v25 }
  0xdf   :  { %v538_v7 = vsel %vm180_vm3, %v511_v16, 0.0  ;;  %v357_v57 = vmul.f32 %v863_v0, %v1391_v22  ;;  %v751_v53 = vsub.f32 %v355_v29, %v703_v10  ;;  %vm367_vm7 = vcmp.eq.f32.partialorder %v1423_v49, 0.0 }
  0xe0   :  { %868 = vrsqrt.f32 %v1437_v58  ;;  %v298_v55 = vadd.f32 %v286_v2, %v1258_v36  ;;  %v610_v27 = vsub.f32 %v538_v7, %v586_v6  ;;  %v368_v38 = vand.u32 2147483648, %v1423_v49 }
  0xe1   :  { %v212_v14 = vpop.permute.xlu1 %211  ;;  %v359_v36 = vsel %vm358_vm0, %v1391_v22, %v357_v57  ;;  %vm713_vm8 = vcmp.eq.f32.partialorder %v1437_v58, inf  ;;  %vm715_vm9 = vcmp.eq.f32.partialorder %v1437_v58, 0.0  ;;  %v763_v39 = vand.u32 2147483647, %v751_v53 }
  0xe2   :  { %v865_v11 = vpop.eup %864  ;;  %v1457_v13 = vadd.f32 1e-06, %v298_v55  ;;  %v634_v41 = vmul.f32 %v610_v27, %v610_v27  ;;  %v163_v15 = vpop.permute.xlu0 %162  ;;  %v239_v12 = vsel %vm229_vm2, 0.0, %v212_v14  ;;  %v362_v23 = vsel %vm360_vm1, %v361_v45, %v359_v36 }
  0xe3   :  { %v705_v9 = vmul.f32 %v865_v11, %v1404_v33  ;;  %v190_v3 = vsel %vm180_vm3, %v163_v15, 0.0  ;;  %v777_v47 = vadd.f32 %v776_v46, %v775_v4  ;;  %v778_v2 = vsel %vm770_vm10, %v762_v40, 0.0 }
  0xe4   :  { %870 = vrsqrt.f32 %v1457_v13  ;;  %v646_v20 = vadd.f32 %v634_v41, %v1260_v61  ;;  %v263_v34 = vsub.f32 %v190_v3, %v239_v12  ;;  %v716_v26 = vand.u32 2147483648, %v1437_v58 }
  0xe5   :  { %v707_v37 = vsel %vm706_vm4, %v1404_v33, %v705_v9  ;;  %v561_v44 = vpop.permute.xlu1 %560  ;;  %v779_v7 = vadd.f32 %v778_v2, %v777_v47  ;;  %v780_v29 = vsel %vm770_vm10, %v763_v39, 0.0  ;;  %vm372_vm11 = vcmp.eq.f32.partialorder %v1457_v13, inf }
  0xe6   :  { %v867_v35 = vpop.eup %866  ;;  %v1475_v30 = vadd.f32 1e-06, %v646_v20  ;;  %v287_v43 = vmul.f32 %v263_v34, %v263_v34  ;;  %v513_v5 = vpop.permute.xlu0 %512  ;;  %v710_v61 = vsel %vm708_vm5, %v709_v17, %v707_v37  ;;  %v587_v21 = vsel %vm229_vm2, 0.0, %v561_v44 }
  0xe7   :  { %v539_v22 = vsel %vm180_vm3, %v513_v5, 0.0  ;;  %v364_v48 = vmul.f32 %v867_v35, %v1423_v49  ;;  %v752_v51 = vsub.f32 %v362_v23, %v710_v61  ;;  %vm374_vm12 = vcmp.eq.f32.partialorder %v1457_v13, 0.0 }
  0xe8   :  { %872 = vrsqrt.f32 %v1475_v30  ;;  %v299_v33 = vadd.f32 %v287_v43, %v1264_v28  ;;  %v611_v18 = vsub.f32 %v539_v22, %v587_v21  ;;  %vm720_vm13 = vcmp.eq.f32.partialorder %v1475_v30, inf }
  0xe9   :  { %v214_v60 = vpop.permute.xlu1 %213  ;;  %v366_v28 = vsel %vm365_vm6, %v1423_v49, %v364_v48  ;;  %v764_v6 = vand.u32 2147483647, %v752_v51  ;;  %v781_v34 = vadd.f32 %v780_v29, %v779_v7  ;;  %v723_v43 = vand.u32 2147483648, %v1475_v30 }
  0xea   :  { %v869_v8 = vpop.eup %868  ;;  %v1487_v31 = vadd.f32 1e-06, %v299_v33  ;;  %v635_v19 = vmul.f32 %v611_v18, %v611_v18  ;;  %v165_v42 = vpop.permute.xlu0 %164  ;;  %v240_v52 = vsel %vm229_vm2, 0.0, %v214_v60  ;;  %v369_v45 = vsel %vm367_vm7, %v368_v38, %v366_v28 }
  0xeb   :  { %v191_v32 = vsel %vm180_vm3, %v165_v42, 0.0  ;;  %v712_v50 = vmul.f32 %v869_v8, %v1437_v58  ;;  %v782_v37 = vsel %vm770_vm10, %v764_v6, 0.0  ;;  %vm722_vm14 = vcmp.eq.f32.partialorder %v1475_v30, 0.0 }
  0xec   :  { %874 = vrsqrt.f32 %v1487_v31  ;;  %v647_v62 = vadd.f32 %v635_v19, %v1266_v56  ;;  %v264_v16 = vsub.f32 %v191_v32, %v240_v52  ;;  %v783_v61 = vadd.f32 %v782_v37, %v781_v34 }
  0xed   :  { %v714_v0 = vsel %vm713_vm8, %v1437_v58, %v712_v50  ;;  %v563_v55 = vpop.permute.xlu1 %562  ;;  %v375_v58 = vand.u32 2147483648, %v1457_v13  ;;  %vm379_vm15 = vcmp.eq.f32.partialorder %v1487_v31, inf  ;;  %v382_v50 = vand.u32 2147483648, %v1487_v31 }
  0xee   :  { %v871_v25 = vpop.eup %870  ;;  %v1504_v4 = vadd.f32 1e-06, %v647_v62  ;;  %v288_v57 = vmul.f32 %v264_v16, %v264_v16  ;;  %v515_v27 = vpop.permute.xlu0 %514  ;;  %v717_v56 = vsel %vm715_vm9, %v716_v26, %v714_v0  ;;  %v588_v49 = vsel %vm229_vm2, 0.0, %v563_v55 }
  0xef   :  { %v540_v10 = vsel %vm180_vm3, %v515_v27, 0.0  ;;  %v371_v59 = vmul.f32 %v871_v25, %v1457_v13  ;;  %v753_v11 = vsub.f32 %v369_v45, %v717_v56 }
  0xf0   :  { %876 = vrsqrt.f32 %v1504_v4  ;;  %v300_v41 = vadd.f32 %v288_v57, %v1268_v54  ;;  %v612_v14 = vsub.f32 %v540_v10, %v588_v49  ;;  %vm729_vm0 = vcmp.eq.f32.partialorder %v1504_v4, 0.0 }
  0xf1   :  { %v373_v15 = vsel %vm372_vm11, %v1457_v13, %v371_v59  ;;  %v216_v12 = vpop.permute.xlu1 %215  ;;  %v765_v20 = vand.u32 2147483647, %v753_v11 }
  0xf2   :  { %v873_v36 = vpop.eup %872  ;;  %v1519_v53 = vadd.f32 1e-06, %v300_v41  ;;  %v636_v9 = vmul.f32 %v612_v14, %v612_v14  ;;  %v167_v3 = vpop.permute.xlu0 %166  ;;  %v241_v54 = vsel %vm229_vm2, 0.0, %v216_v12  ;;  %v376_v44 = vsel %vm374_vm12, %v375_v58, %v373_v15 }
  0xf3   :  { %v192_v17 = vsel %vm180_vm3, %v167_v3, 0.0  ;;  %v719_v23 = vmul.f32 %v873_v36, %v1475_v30 }
  0xf4   :  { %878 = vrsqrt.f32 %v1519_v53  ;;  %v648_v40 = vadd.f32 %v636_v9, %v1316_v63  ;;  %v265_v35 = vsub.f32 %v192_v17, %v241_v54  ;;  %v784_v63 = vsel %vm770_vm10, %v765_v20, 0.0 }
  0xf5   :  { %v721_v5 = vsel %vm720_vm13, %v1475_v30, %v719_v23  ;;  %v565_v48 = vpop.permute.xlu1 %564  ;;  %v625_v30 = vmul.f32 %v1354_v24, %v1354_v24  ;;  %v785_v52 = vadd.f32 %v784_v63, %v783_v61  ;;  %v730_v24 = vand.u32 2147483648, %v1504_v4 }
  0xf6   :  { %v875_v46 = vpop.eup %874  ;;  %v660_v21 = vadd.f32 1e-06, %v648_v40  ;;  %v289_v22 = vmul.f32 %v265_v35, %v265_v35  ;;  %v517_v51 = vpop.permute.xlu0 %516  ;;  %v724_v33 = vsel %vm722_vm14, %v723_v43, %v721_v5  ;;  %v589_v18 = vsel %vm229_vm2, 0.0, %v565_v48 }
  0xf7   :  { %v541_v13 = vsel %vm180_vm3, %v517_v51, 0.0  ;;  %v378_v38 = vmul.f32 %v875_v46, %v1487_v31  ;;  %v754_v39 = vsub.f32 %v376_v44, %v724_v33  ;;  %vm727_vm2 = vcmp.eq.f32.partialorder %v1504_v4, inf }
  0xf8   :  { %880 = vrsqrt.f32 %v660_v21  ;;  %v301_v8 = vadd.f32 %v289_v22, %v1318_v1  ;;  %v613_v19 = vsub.f32 %v541_v13, %v589_v18  ;;  %vm381_vm3 = vcmp.eq.f32.partialorder %v1487_v31, 0.0 }
  0xf9   :  { %v766_v60 = vand.u32 2147483647, %v754_v39  ;;  %v380_v32 = vsel %vm379_vm15, %v1487_v31, %v378_v38  ;;  %vm386_vm1 = vcmp.eq.f32.partialorder %v1519_v53, inf  ;;  %vm734_vm4 = vcmp.eq.f32.partialorder %v660_v21, inf }
  0xfa   :  { %v877_v42 = vpop.eup %876  ;;  %v313_v28 = vadd.f32 1e-06, %v301_v8  ;;  %v637_v47 = vmul.f32 %v613_v19, %v613_v19  ;;  %v383_v6 = vsel %vm381_vm3, %v382_v50, %v380_v32  ;;  %v737_v49 = vand.u32 2147483648, %v660_v21 }
  0xfb   :  { %v726_v2 = vmul.f32 %v877_v42, %v1504_v4  ;;  %v786_v62 = vsel %vm770_vm10, %v766_v60, 0.0  ;;  %vm388_vm5 = vcmp.eq.f32.partialorder %v1519_v53, 0.0  ;;  %vm736_vm6 = vcmp.eq.f32.partialorder %v660_v21, 0.0 }
  0xfc   :  { %882 = vrsqrt.f32 %v313_v28  ;;  %v649_v1 = vadd.f32 %v637_v47, %v625_v30  ;;  %v787_v26 = vadd.f32 %v786_v62, %v785_v52  ;;  %vm393_vm7 = vcmp.eq.f32.partialorder %v313_v28, inf }
  0xfd   :  { %v728_v16 = vsel %vm727_vm2, %v1504_v4, %v726_v2  ;;  %v389_v4 = vand.u32 2147483648, %v1519_v53  ;;  %v396_v20 = vand.u32 2147483648, %v313_v28  ;;  %vm395_vm9 = vcmp.eq.f32.partialorder %v313_v28, 0.0 }
  0xfe   :  { %v879_v45 = vpop.eup %878  ;;  %v661_v0 = vadd.f32 1e-06, %v649_v1  ;;  %v731_v7 = vsel %vm729_vm0, %v730_v24, %v728_v16 }
  0xff   :  { %v385_v25 = vmul.f32 %v879_v45, %v1519_v53  ;;  %v755_v57 = vsub.f32 %v383_v6, %v731_v7 }
 0x100   :  { %884 = vrsqrt.f32 %v661_v0  ;;  %vm741_vm8 = vcmp.eq.f32.partialorder %v661_v0, inf  ;;  %v744_v34 = vand.u32 2147483648, %v661_v0  ;;  %vm743_vm11 = vcmp.eq.f32.partialorder %v661_v0, 0.0 }
 0x101   :  { %v767_v55 = vand.u32 2147483647, %v755_v57  ;;  %v387_v56 = vsel %vm386_vm1, %v1519_v53, %v385_v25 }
 0x102   :  { %v881_v27 = vpop.eup %880  ;;  %v390_v41 = vsel %vm388_vm5, %v389_v4, %v387_v56 }
 0x103   :  { %v733_v31 = vmul.f32 %v881_v27, %v660_v21  ;;  %v788_v29 = vsel %vm770_vm10, %v767_v55, 0.0 }
 0x104   :  { %v789_v10 = vadd.f32 %v788_v29, %v787_v26 }
 0x105   :  { %v735_v59 = vsel %vm734_vm4, %v660_v21, %v733_v31 }
 0x106   :  { %v883_v11 = vpop.eup %882  ;;  %v738_v14 = vsel %vm736_vm6, %v737_v49, %v735_v59 }
 0x107   :  { %v392_v15 = vmul.f32 %v883_v11, %v313_v28  ;;  %v756_v58 = vsub.f32 %v390_v41, %v738_v14 }
 0x109   :  { %v394_v9 = vsel %vm393_vm7, %v313_v28, %v392_v15  ;;  %v768_v3 = vand.u32 2147483647, %v756_v58 }
 0x10a   :  { %v885_v36 = vpop.eup %884  ;;  %v397_v17 = vsel %vm395_vm9, %v396_v20, %v394_v9 }
 0x10b   :  { %v740_v12 = vmul.f32 %v885_v36, %v661_v0  ;;  %v790_v37 = vsel %vm770_vm10, %v768_v3, 0.0 }
 0x10c   :  { %v791_v35 = vadd.f32 %v790_v37, %v789_v10 }
 0x10d   :  { %v742_v54 = vsel %vm741_vm8, %v661_v0, %v740_v12 }
 0x10e   :  { %v745_v53 = vsel %vm743_vm11, %v744_v34, %v742_v54 }
 0x10f   :  { %v757_v23 = vsub.f32 %v397_v17, %v745_v53 }
 0x111   :  { %v769_v40 = vand.u32 2147483647, %v757_v23 }
 0x113   :  { %v792_v43 = vsel %vm770_vm10, %v769_v40, 0.0 }
 0x114   :  { %v793_v44 = vadd.f32 %v792_v43, %v791_v35 }
 0x116   :  { %794 = vadd.xlane.f32.xlu0 %v793_v44 }
 0x1a3   :  { %v795_v5 = vpop.xlane.xlu0 %794 }
 0x1a4   :  { %v796_v61 = vrot.slane %v795_v5, 4 }
 0x1a6   :  { %v797_v46 = vadd.f32 %v796_v61, %v795_v5 }
 0x1a8   :  { %v798_v21 = vrot.slane %v797_v46, 2 }
 0x1aa   :  { %v799_v22 = vadd.f32 %v798_v21, %v797_v46 }
 0x1ac   :  { %v800_v48 = vrot.slane %v799_v22, 1 }
 0x1ae   :  { %v801_v51 = vadd.f32 %v800_v48, %v799_v22 }
 0x1b0   :  { %829 = vpush %v801_v51 }
 0x1e1   :  { %s830_s1 = spop %829 }
 0x1e2   :  { %s811_s8 = smul.f32 0.0006510417, %s830_s1 }
 0x1e4   :  { %813 = sst [smem:[#allocation8]] %s811_s8 }
 0x1e5   :  { %939 = shalt.err (!%p936_p4)
}
 0x1e6   :  { %s952_s16 = smov [#allocation8]  }
 0x1e7   :  { %821 = dma.smem_to_hbm %s952_s16, 16, %s1573_s2, [#allocation5]  }
 0x1e8   :  { %944 = dma.done.wait [#allocation5], 16  }
 0x1e9   :  { %945 = vsyncadd [#allocation5], 4294967280 }
 0x1ea   :  { %825 = sfence }
 0x1eb   :  { %826 = vsyncpa [#allocation4], 1 }
 0x1ec   :  { %827 = vsyncpa [#allocation7], 1 }
 0x1ed   :  { %828 = vsyncpa [#allocation5], 1 }

</bundles_post_ra>
